<compile_context>
chip_gen: v6e
topology: v6e:2x2x1
jax: 0.10.0
libtpu: 0.0.40
codegen_flags: <defaults>
</compile_context>

<pallas_src>
import jax
import jax.numpy as jnp
import numpy as np
from jax import lax
from jax.experimental import pallas as pl
from jax.experimental.pallas import tpu as pltpu


def _attention_kernel(x_ref, w_ref, b_ref, o_ref):
    # x_ref : (B_blk, C, HW)   bf16, native flattened-NCHW layout (no transpose)
    # w_ref : (3*Co, C)        bf16, fused Q/K/V weight, PyTorch (out, in) layout
    # b_ref : (3*Co, 1)        f32, fused bias
    # o_ref : (B_blk, Co, HW)  f32 output, already in the PyTorch layout
    w = w_ref[...]                        # (3Co, C) bf16
    b_blk = x_ref.shape[0]
    co = o_ref.shape[1]
    hw = o_ref.shape[2]

    # Hoisted bias broadcast: materialized ONCE per grid step (not per batch elem).
    bias_hw = jnp.broadcast_to(b_ref[...], (3 * co, hw))          # (3Co, HW) f32

    def body(b, carry):
        x = x_ref[b]                                              # (C, HW) bf16

        # One fused projection: (3Co, C) @ (C, HW) -> (3Co, HW), f32 accumulate.
        proj = jnp.dot(w, x, preferred_element_type=jnp.float32) + bias_hw
        qt = proj[0:co].astype(jnp.bfloat16)       # (Co, HW) == Q^T
        kt = proj[co:2 * co].astype(jnp.bfloat16)  # (Co, HW) == K^T
        vt = proj[2 * co:3 * co]                   # (Co, HW) == V^T, kept f32

        # s[i, j] = sum_h qt[i, h] * kt[j, h]  (contract HW; no explicit transpose)
        s = lax.dot_general(qt, kt, (((1,), (1,)), ((), ())),
                            preferred_element_type=jnp.float32)   # (Co, Co) f32

        # softmax over the last dim (dim=2 in the PyTorch code), f32 throughout;
        # approx reciprocal uses the otherwise-idle EUP slot (free when mem-bound).
        s = s - jnp.max(s, axis=-1, keepdims=True)
        e = jnp.exp(s)
        att = e * pl.reciprocal(jnp.sum(e, axis=-1, keepdims=True), approx=True)

        # (Co, Co) @ (Co, HW) -> (Co, HW): already the PyTorch output layout.
        o_ref[b] = jnp.dot(att, vt,
                           preferred_element_type=jnp.float32).astype(o_ref.dtype)
        return carry

    # fori_loop bounds live ranges (no giant static unroll); fully unroll only
    # small fixed trip counts so the LLO scheduler can interleave iterations.
    lax.fori_loop(0, b_blk, body, 0, unroll=(b_blk <= 8))


def _choose_batch_block(N, C, Co, HW, *, min_grid_steps=16,
                        vmem_block_budget=8 * 1024 * 1024):
    """Pick a batch tile that (a) fits a modest double-buffered VMEM budget and
    (b) yields many grid steps (>= ~16 so each v7x TensorCore pipelines >= ~8),
    rounded down to a divisor of N so no padding / assert failures occur."""
    per_b = 2 * (C * HW * 2 + Co * HW * 4)      # double-buffered bf16 in + f32 out
    bb = max(1, min(vmem_block_budget // per_b, max(1, N // min_grid_steps), N))
    while N % bb:                                # divisor of N (handles odd N)
        bb -= 1
    return bb


def attention_forward(batch_flat, wq, bq, wk, bk, wv, bv, *, batch_block=None):
    """batch_flat: (N, C, HW); w*: (Co, C) PyTorch-style; b*: (Co,). Returns f32 (N, Co, HW)."""
    N, C, HW = batch_flat.shape
    Co = wq.shape[0]

    if batch_block is None:
        batch_block = _choose_batch_block(N, C, Co, HW)
    else:
        batch_block = max(1, min(batch_block, N))
        while N % batch_block:
            batch_block -= 1
    grid = (N // batch_block,)

    # bf16 storage for the bandwidth-dominant operands; bias stays f32 (added
    # post-matmul onto the f32 accumulator).  Fused (3Co, C) weight: one MXU
    # projection per batch element instead of three, fewer operand DMAs.
    x_bf16 = batch_flat.astype(jnp.bfloat16)
    w_qkv = jnp.concatenate([wq, wk, wv], axis=0).astype(jnp.bfloat16)          # (3Co, C)
    b_qkv = jnp.concatenate([bq, bk, bv], axis=0).astype(jnp.float32)[:, None]  # (3Co, 1)

    grid_spec = pltpu.PrefetchScalarGridSpec(
        num_scalar_prefetch=0,
        grid=grid,
        in_specs=[
            pl.BlockSpec((batch_block, C, HW), lambda i: (i, 0, 0)),  # x, native layout
            pl.BlockSpec((3 * Co, C), lambda i: (0, 0)),              # fused weight (resident)
            pl.BlockSpec((3 * Co, 1), lambda i: (0, 0)),              # fused bias (resident)
        ],
        out_specs=pl.BlockSpec((batch_block, Co, HW), lambda i: (i, 0, 0)),
    )

    return pl.pallas_call(
        _attention_kernel,
        out_shape=jax.ShapeDtypeStruct((N, Co, HW), jnp.float32),
        grid_spec=grid_spec,
        compiler_params=pltpu.CompilerParams(
            dimension_semantics=("parallel",),      # v7x: shard batch steps across 2 TCs
            vmem_limit_bytes=32 * 1024 * 1024,      # explicit; safe on v5e/v6e/v7x
        ),
    )(x_bf16, w_qkv, b_qkv)


def attention_reference(batch_flat, wq, bq, wk, bk, wv, bv):
    """Pure-JAX reference mirroring the PyTorch forward, applying the same bf16
    quantization of matmul operands the kernel uses (isolates algebra/layout
    correctness from the deliberate storage-precision tradeoff)."""
    q16 = lambda a: a.astype(jnp.bfloat16).astype(jnp.float32)
    hi = lax.Precision.HIGHEST
    x = jnp.transpose(q16(batch_flat), (0, 2, 1))                       # (N, HW, C)
    Q = jnp.einsum("nhc,oc->nho", x, q16(wq), precision=hi) + bq
    K = jnp.einsum("nhc,oc->nho", x, q16(wk), precision=hi) + bk
    V = jnp.einsum("nhc,oc->nho", x, q16(wv), precision=hi) + bv
    s = jnp.einsum("nho,nhp->nop", q16(Q), q16(K), precision=hi)        # Q^T @ K -> (N, Co, Co)
    att = jax.nn.softmax(s, axis=2)
    return jnp.einsum("nop,nhp->noh", att, V, precision=hi)             # att @ V^T -> (N, Co, HW)


if __name__ == "__main__":
    # Small shapes consistent with the module's forward.  HW = H*W = 128 keeps loads
    # and the (Co, HW) output stores lane-dense; N=64 with the auto batch_block (=4)
    # gives a 16-step grid so both v7x TensorCores get a pipelined stream of blocks.
    N, C, H, W = 64, 16, 16, 8
    HW = H * W
    Co = 8   # channels_out

    key = jax.random.PRNGKey(0)
    kx, kwq, kbq, kwk, kbk, kwv, kbv = jax.random.split(key, 7)

    batch_flat = jax.random.normal(kx, (N, C, HW), dtype=jnp.float32)

    # Deterministic Linear params (PyTorch layout: weight (out, in), bias (out,))
    scale = 1.0 / np.sqrt(C)
    wq = jax.random.uniform(kwq, (Co, C), jnp.float32, -scale, scale)
    bq = jax.random.uniform(kbq, (Co,), jnp.float32, -scale, scale)
    wk = jax.random.uniform(kwk, (Co, C), jnp.float32, -scale, scale)
    bk = jax.random.uniform(kbk, (Co,), jnp.float32, -scale, scale)
    wv = jax.random.uniform(kwv, (Co, C), jnp.float32, -scale, scale)
    bv = jax.random.uniform(kbv, (Co,), jnp.float32, -scale, scale)

    out = attention_forward(batch_flat, wq, bq, wk, bk, wv, bv)
    out = jax.block_until_ready(out)

    ref = attention_reference(batch_flat, wq, bq, wk, bk, wv, bv)
    # Tolerance covers bf16 matmul-operand rounding differences plus the EUP
    # approximate reciprocal in the softmax (both sides use the same quantized
    # inputs, so the residual mismatch is small and bounded).
    np.testing.assert_allclose(np.asarray(out), np.asarray(ref), rtol=2e-2, atol=2e-2)
    assert out.shape == (N, Co, HW)

    print("KERNEL_OK")
</pallas_src>

<mosaic_0001>
module attributes {stable_mosaic.version = 11 : i64} {
  func.func @_attention_kernel(%arg0: i32, %arg1: memref<4x16x128xbf16, #tpu.memory_space<vmem>>, %arg2: memref<24x16xbf16, #tpu.memory_space<vmem>>, %arg3: memref<24x1xf32, #tpu.memory_space<vmem>>, %arg4: memref<4x8x128xf32, #tpu.memory_space<vmem>>) attributes {dimension_semantics = [#tpu.dimension_semantics<parallel>], iteration_bounds = array<i64: 16>, scalar_prefetch = 0 : i64, scratch_operands = 0 : i64, tpu.core_type = #tpu.core_type<tc>, window_params = [{transform_indices = @transform_0, window_bounds = array<i64: 4, 16, 128>}, {pipeline_mode = #tpu.pipeline_mode<synchronous>, transform_indices = @transform_1, window_bounds = array<i64: 24, 16>}, {pipeline_mode = #tpu.pipeline_mode<synchronous>, transform_indices = @transform_2, window_bounds = array<i64: 24, 1>}, {transform_indices = @transform_3, window_bounds = array<i64: 4, 8, 128>}]} {
    %c0 = arith.constant 0 : index
    %c0_0 = arith.constant 0 : index
    %0 = vector.load %arg2[%c0, %c0_0] : memref<24x16xbf16, #tpu.memory_space<vmem>>, vector<24x16xbf16>
    %c0_1 = arith.constant 0 : index
    %c0_2 = arith.constant 0 : index
    %1 = vector.load %arg3[%c0_1, %c0_2] : memref<24x1xf32, #tpu.memory_space<vmem>>, vector<24x1xf32>
    %2 = vector.shape_cast %1 : vector<24x1xf32> to vector<24x1xf32>
    %3 = vector.broadcast %2 : vector<24x1xf32> to vector<24x128xf32>
    %c0_i32 = arith.constant 0 : i32
    %4 = arith.index_cast %c0_i32 : i32 to index
    %c0_3 = arith.constant 0 : index
    %c0_4 = arith.constant 0 : index
    %5 = vector.load %arg1[%4, %c0_3, %c0_4] : memref<4x16x128xbf16, #tpu.memory_space<vmem>>, vector<1x16x128xbf16>
    %6 = vector.shape_cast %5 : vector<1x16x128xbf16> to vector<16x128xbf16>
    %cst = arith.constant dense<0.000000e+00> : vector<24x128xf32>
    %7 = tpu.matmul %0, %6, %cst {dimension_numbers = #tpu.dot_dimension_numbers<[1], [0], [0], [1], [0, 0, 1, 1], [], []>} : vector<24x16xbf16>, vector<16x128xbf16>, vector<24x128xf32> -> vector<24x128xf32>
    %8 = arith.addf %7, %3 : vector<24x128xf32>
    %9 = vector.extract_strided_slice %8 {offsets = [0, 0], sizes = [8, 128], strides = [1, 1]} : vector<24x128xf32> to vector<8x128xf32>
    %10 = arith.truncf %9 : vector<8x128xf32> to vector<8x128xbf16>
    %11 = vector.extract_strided_slice %8 {offsets = [8, 0], sizes = [8, 128], strides = [1, 1]} : vector<24x128xf32> to vector<8x128xf32>
    %12 = arith.truncf %11 : vector<8x128xf32> to vector<8x128xbf16>
    %13 = vector.extract_strided_slice %8 {offsets = [16, 0], sizes = [8, 128], strides = [1, 1]} : vector<24x128xf32> to vector<8x128xf32>
    %cst_5 = arith.constant dense<0.000000e+00> : vector<8x8xf32>
    %14 = tpu.matmul %10, %12, %cst_5 {dimension_numbers = #tpu.dot_dimension_numbers<[1], [1], [0], [0], [0, 0, 1, 0], [], []>} : vector<8x128xbf16>, vector<8x128xbf16>, vector<8x8xf32> -> vector<8x8xf32>
    %cst_6 = arith.constant dense<0xFF800000> : vector<8xf32>
    %15 = vector.multi_reduction <maximumf>, %14, %cst_6 [1] : vector<8x8xf32> to vector<8xf32>
    %16 = vector.shape_cast %15 : vector<8xf32> to vector<8x1xf32>
    %17 = vector.broadcast %16 : vector<8x1xf32> to vector<8x8xf32>
    %18 = arith.subf %14, %17 : vector<8x8xf32>
    %19 = math.exp %18 : vector<8x8xf32>
    %cst_7 = arith.constant dense<0.000000e+00> : vector<8xf32>
    %20 = vector.multi_reduction <add>, %19, %cst_7 [1] : vector<8x8xf32> to vector<8xf32>
    %21 = vector.shape_cast %20 : vector<8xf32> to vector<8x1xf32>
    %22 = tpu.reciprocal %21 {approx = true} : vector<8x1xf32> -> vector<8x1xf32>
    %23 = vector.broadcast %22 : vector<8x1xf32> to vector<8x8xf32>
    %24 = arith.mulf %19, %23 : vector<8x8xf32>
    %cst_8 = arith.constant dense<0.000000e+00> : vector<8x128xf32>
    %25 = tpu.matmul %24, %13, %cst_8 {dimension_numbers = #tpu.dot_dimension_numbers<[1], [0], [0], [1], [0, 0, 1, 1], [], []>} : vector<8x8xf32>, vector<8x128xf32>, vector<8x128xf32> -> vector<8x128xf32>
    %26 = arith.index_cast %c0_i32 : i32 to index
    %c0_9 = arith.constant 0 : index
    %c0_10 = arith.constant 0 : index
    %27 = vector.load %arg4[%26, %c0_9, %c0_10] : memref<4x8x128xf32, #tpu.memory_space<vmem>>, vector<1x8x128xf32>
    %28 = vector.shape_cast %27 : vector<1x8x128xf32> to vector<8x128xf32>
    %29 = vector.shape_cast %25 : vector<8x128xf32> to vector<1x8x128xf32>
    tpu.vector_store %arg4[%26, %c0_9, %c0_10], %29 {strides = array<i32>} : memref<4x8x128xf32, #tpu.memory_space<vmem>>, vector<1x8x128xf32>,
    %c1_i32 = arith.constant 1 : i32
    %30 = arith.index_cast %c1_i32 : i32 to index
    %c0_11 = arith.constant 0 : index
    %c0_12 = arith.constant 0 : index
    %31 = vector.load %arg1[%30, %c0_11, %c0_12] : memref<4x16x128xbf16, #tpu.memory_space<vmem>>, vector<1x16x128xbf16>
    %32 = vector.shape_cast %31 : vector<1x16x128xbf16> to vector<16x128xbf16>
    %cst_13 = arith.constant dense<0.000000e+00> : vector<24x128xf32>
    %33 = tpu.matmul %0, %32, %cst_13 {dimension_numbers = #tpu.dot_dimension_numbers<[1], [0], [0], [1], [0, 0, 1, 1], [], []>} : vector<24x16xbf16>, vector<16x128xbf16>, vector<24x128xf32> -> vector<24x128xf32>
    %34 = arith.addf %33, %3 : vector<24x128xf32>
    %35 = vector.extract_strided_slice %34 {offsets = [0, 0], sizes = [8, 128], strides = [1, 1]} : vector<24x128xf32> to vector<8x128xf32>
    %36 = arith.truncf %35 : vector<8x128xf32> to vector<8x128xbf16>
    %37 = vector.extract_strided_slice %34 {offsets = [8, 0], sizes = [8, 128], strides = [1, 1]} : vector<24x128xf32> to vector<8x128xf32>
    %38 = arith.truncf %37 : vector<8x128xf32> to vector<8x128xbf16>
    %39 = vector.extract_strided_slice %34 {offsets = [16, 0], sizes = [8, 128], strides = [1, 1]} : vector<24x128xf32> to vector<8x128xf32>
    %cst_14 = arith.constant dense<0.000000e+00> : vector<8x8xf32>
    %40 = tpu.matmul %36, %38, %cst_14 {dimension_numbers = #tpu.dot_dimension_numbers<[1], [1], [0], [0], [0, 0, 1, 0], [], []>} : vector<8x128xbf16>, vector<8x128xbf16>, vector<8x8xf32> -> vector<8x8xf32>
    %cst_15 = arith.constant dense<0xFF800000> : vector<8xf32>
    %41 = vector.multi_reduction <maximumf>, %40, %cst_15 [1] : vector<8x8xf32> to vector<8xf32>
    %42 = vector.shape_cast %41 : vector<8xf32> to vector<8x1xf32>
    %43 = vector.broadcast %42 : vector<8x1xf32> to vector<8x8xf32>
    %44 = arith.subf %40, %43 : vector<8x8xf32>
    %45 = math.exp %44 : vector<8x8xf32>
    %cst_16 = arith.constant dense<0.000000e+00> : vector<8xf32>
    %46 = vector.multi_reduction <add>, %45, %cst_16 [1] : vector<8x8xf32> to vector<8xf32>
    %47 = vector.shape_cast %46 : vector<8xf32> to vector<8x1xf32>
    %48 = tpu.reciprocal %47 {approx = true} : vector<8x1xf32> -> vector<8x1xf32>
    %49 = vector.broadcast %48 : vector<8x1xf32> to vector<8x8xf32>
    %50 = arith.mulf %45, %49 : vector<8x8xf32>
    %cst_17 = arith.constant dense<0.000000e+00> : vector<8x128xf32>
    %51 = tpu.matmul %50, %39, %cst_17 {dimension_numbers = #tpu.dot_dimension_numbers<[1], [0], [0], [1], [0, 0, 1, 1], [], []>} : vector<8x8xf32>, vector<8x128xf32>, vector<8x128xf32> -> vector<8x128xf32>
    %52 = arith.index_cast %c1_i32 : i32 to index
    %c0_18 = arith.constant 0 : index
    %c0_19 = arith.constant 0 : index
    %53 = vector.load %arg4[%52, %c0_18, %c0_19] : memref<4x8x128xf32, #tpu.memory_space<vmem>>, vector<1x8x128xf32>
    %54 = vector.shape_cast %53 : vector<1x8x128xf32> to vector<8x128xf32>
    %55 = vector.shape_cast %51 : vector<8x128xf32> to vector<1x8x128xf32>
    tpu.vector_store %arg4[%52, %c0_18, %c0_19], %55 {strides = array<i32>} : memref<4x8x128xf32, #tpu.memory_space<vmem>>, vector<1x8x128xf32>,
    %c2_i32 = arith.constant 2 : i32
    %56 = arith.index_cast %c2_i32 : i32 to index
    %c0_20 = arith.constant 0 : index
    %c0_21 = arith.constant 0 : index
    %57 = vector.load %arg1[%56, %c0_20, %c0_21] : memref<4x16x128xbf16, #tpu.memory_space<vmem>>, vector<1x16x128xbf16>
    %58 = vector.shape_cast %57 : vector<1x16x128xbf16> to vector<16x128xbf16>
    %cst_22 = arith.constant dense<0.000000e+00> : vector<24x128xf32>
    %59 = tpu.matmul %0, %58, %cst_22 {dimension_numbers = #tpu.dot_dimension_numbers<[1], [0], [0], [1], [0, 0, 1, 1], [], []>} : vector<24x16xbf16>, vector<16x128xbf16>, vector<24x128xf32> -> vector<24x128xf32>
    %60 = arith.addf %59, %3 : vector<24x128xf32>
    %61 = vector.extract_strided_slice %60 {offsets = [0, 0], sizes = [8, 128], strides = [1, 1]} : vector<24x128xf32> to vector<8x128xf32>
    %62 = arith.truncf %61 : vector<8x128xf32> to vector<8x128xbf16>
    %63 = vector.extract_strided_slice %60 {offsets = [8, 0], sizes = [8, 128], strides = [1, 1]} : vector<24x128xf32> to vector<8x128xf32>
    %64 = arith.truncf %63 : vector<8x128xf32> to vector<8x128xbf16>
    %65 = vector.extract_strided_slice %60 {offsets = [16, 0], sizes = [8, 128], strides = [1, 1]} : vector<24x128xf32> to vector<8x128xf32>
    %cst_23 = arith.constant dense<0.000000e+00> : vector<8x8xf32>
    %66 = tpu.matmul %62, %64, %cst_23 {dimension_numbers = #tpu.dot_dimension_numbers<[1], [1], [0], [0], [0, 0, 1, 0], [], []>} : vector<8x128xbf16>, vector<8x128xbf16>, vector<8x8xf32> -> vector<8x8xf32>
    %cst_24 = arith.constant dense<0xFF800000> : vector<8xf32>
    %67 = vector.multi_reduction <maximumf>, %66, %cst_24 [1] : vector<8x8xf32> to vector<8xf32>
    %68 = vector.shape_cast %67 : vector<8xf32> to vector<8x1xf32>
    %69 = vector.broadcast %68 : vector<8x1xf32> to vector<8x8xf32>
    %70 = arith.subf %66, %69 : vector<8x8xf32>
    %71 = math.exp %70 : vector<8x8xf32>
    %cst_25 = arith.constant dense<0.000000e+00> : vector<8xf32>
    %72 = vector.multi_reduction <add>, %71, %cst_25 [1] : vector<8x8xf32> to vector<8xf32>
    %73 = vector.shape_cast %72 : vector<8xf32> to vector<8x1xf32>
    %74 = tpu.reciprocal %73 {approx = true} : vector<8x1xf32> -> vector<8x1xf32>
    %75 = vector.broadcast %74 : vector<8x1xf32> to vector<8x8xf32>
    %76 = arith.mulf %71, %75 : vector<8x8xf32>
    %cst_26 = arith.constant dense<0.000000e+00> : vector<8x128xf32>
    %77 = tpu.matmul %76, %65, %cst_26 {dimension_numbers = #tpu.dot_dimension_numbers<[1], [0], [0], [1], [0, 0, 1, 1], [], []>} : vector<8x8xf32>, vector<8x128xf32>, vector<8x128xf32> -> vector<8x128xf32>
    %78 = arith.index_cast %c2_i32 : i32 to index
    %c0_27 = arith.constant 0 : index
    %c0_28 = arith.constant 0 : index
    %79 = vector.load %arg4[%78, %c0_27, %c0_28] : memref<4x8x128xf32, #tpu.memory_space<vmem>>, vector<1x8x128xf32>
    %80 = vector.shape_cast %79 : vector<1x8x128xf32> to vector<8x128xf32>
    %81 = vector.shape_cast %77 : vector<8x128xf32> to vector<1x8x128xf32>
    tpu.vector_store %arg4[%78, %c0_27, %c0_28], %81 {strides = array<i32>} : memref<4x8x128xf32, #tpu.memory_space<vmem>>, vector<1x8x128xf32>,
    %c3_i32 = arith.constant 3 : i32
    %82 = arith.index_cast %c3_i32 : i32 to index
    %c0_29 = arith.constant 0 : index
    %c0_30 = arith.constant 0 : index
    %83 = vector.load %arg1[%82, %c0_29, %c0_30] : memref<4x16x128xbf16, #tpu.memory_space<vmem>>, vector<1x16x128xbf16>
    %84 = vector.shape_cast %83 : vector<1x16x128xbf16> to vector<16x128xbf16>
    %cst_31 = arith.constant dense<0.000000e+00> : vector<24x128xf32>
    %85 = tpu.matmul %0, %84, %cst_31 {dimension_numbers = #tpu.dot_dimension_numbers<[1], [0], [0], [1], [0, 0, 1, 1], [], []>} : vector<24x16xbf16>, vector<16x128xbf16>, vector<24x128xf32> -> vector<24x128xf32>
    %86 = arith.addf %85, %3 : vector<24x128xf32>
    %87 = vector.extract_strided_slice %86 {offsets = [0, 0], sizes = [8, 128], strides = [1, 1]} : vector<24x128xf32> to vector<8x128xf32>
    %88 = arith.truncf %87 : vector<8x128xf32> to vector<8x128xbf16>
    %89 = vector.extract_strided_slice %86 {offsets = [8, 0], sizes = [8, 128], strides = [1, 1]} : vector<24x128xf32> to vector<8x128xf32>
    %90 = arith.truncf %89 : vector<8x128xf32> to vector<8x128xbf16>
    %91 = vector.extract_strided_slice %86 {offsets = [16, 0], sizes = [8, 128], strides = [1, 1]} : vector<24x128xf32> to vector<8x128xf32>
    %cst_32 = arith.constant dense<0.000000e+00> : vector<8x8xf32>
    %92 = tpu.matmul %88, %90, %cst_32 {dimension_numbers = #tpu.dot_dimension_numbers<[1], [1], [0], [0], [0, 0, 1, 0], [], []>} : vector<8x128xbf16>, vector<8x128xbf16>, vector<8x8xf32> -> vector<8x8xf32>
    %cst_33 = arith.constant dense<0xFF800000> : vector<8xf32>
    %93 = vector.multi_reduction <maximumf>, %92, %cst_33 [1] : vector<8x8xf32> to vector<8xf32>
    %94 = vector.shape_cast %93 : vector<8xf32> to vector<8x1xf32>
    %95 = vector.broadcast %94 : vector<8x1xf32> to vector<8x8xf32>
    %96 = arith.subf %92, %95 : vector<8x8xf32>
    %97 = math.exp %96 : vector<8x8xf32>
    %cst_34 = arith.constant dense<0.000000e+00> : vector<8xf32>
    %98 = vector.multi_reduction <add>, %97, %cst_34 [1] : vector<8x8xf32> to vector<8xf32>
    %99 = vector.shape_cast %98 : vector<8xf32> to vector<8x1xf32>
    %100 = tpu.reciprocal %99 {approx = true} : vector<8x1xf32> -> vector<8x1xf32>
    %101 = vector.broadcast %100 : vector<8x1xf32> to vector<8x8xf32>
    %102 = arith.mulf %97, %101 : vector<8x8xf32>
    %cst_35 = arith.constant dense<0.000000e+00> : vector<8x128xf32>
    %103 = tpu.matmul %102, %91, %cst_35 {dimension_numbers = #tpu.dot_dimension_numbers<[1], [0], [0], [1], [0, 0, 1, 1], [], []>} : vector<8x8xf32>, vector<8x128xf32>, vector<8x128xf32> -> vector<8x128xf32>
    %104 = arith.index_cast %c3_i32 : i32 to index
    %c0_36 = arith.constant 0 : index
    %c0_37 = arith.constant 0 : index
    %105 = vector.load %arg4[%104, %c0_36, %c0_37] : memref<4x8x128xf32, #tpu.memory_space<vmem>>, vector<1x8x128xf32>
    %106 = vector.shape_cast %105 : vector<1x8x128xf32> to vector<8x128xf32>
    %107 = vector.shape_cast %103 : vector<8x128xf32> to vector<1x8x128xf32>
    tpu.vector_store %arg4[%104, %c0_36, %c0_37], %107 {strides = array<i32>} : memref<4x8x128xf32, #tpu.memory_space<vmem>>, vector<1x8x128xf32>,
    %c4_i32 = arith.constant 4 : i32
    return
  }
  func.func @transform_0(%arg0: i32) -> (i32, i32, i32) {
    %c0_i32 = arith.constant 0 : i32
    %c0_i32_0 = arith.constant 0 : i32
    %c0_i32_1 = arith.constant 0 : i32
    return %arg0, %c0_i32, %c0_i32_0 : i32, i32, i32
  }
  func.func @transform_1(%arg0: i32) -> (i32, i32) {
    %c0_i32 = arith.constant 0 : i32
    %c0_i32_0 = arith.constant 0 : i32
    %c0_i32_1 = arith.constant 0 : i32
    return %c0_i32, %c0_i32_0 : i32, i32
  }
  func.func @transform_2(%arg0: i32) -> (i32, i32) {
    %c0_i32 = arith.constant 0 : i32
    %c0_i32_0 = arith.constant 0 : i32
    %c0_i32_1 = arith.constant 0 : i32
    return %c0_i32, %c0_i32_0 : i32, i32
  }
  func.func @transform_3(%arg0: i32) -> (i32, i32, i32) {
    %c0_i32 = arith.constant 0 : i32
    %c0_i32_0 = arith.constant 0 : i32
    %c0_i32_1 = arith.constant 0 : i32
    return %arg0, %c0_i32, %c0_i32_0 : i32, i32, i32
  }
}

</mosaic_0001>

<bundles_post_ra>
// kernel: tpu_custom_call.1
= control target key start
LH: loop header
LB: loop body
LE: loop exit
PB: predicated region body
PF: predicated region fallthrough
CT: control target
= control target key end

     0   :  { %8 = vsyncpa [#allocation3], 0  ;;  %s1653_s0 = inlined_call_operand.hbm [shape: bf16[64,16,128], index: 0, kind: input, shape index: {}]   ;;  %s1654_s1 = inlined_call_operand.vmem [shape: bf16[24,16], index: 1, kind: input, shape index: {}]   ;;  %s1655_s2 = inlined_call_operand.vmem [shape: f32[24,1], index: 2, kind: input, shape index: {}]   ;;  %s1656_s3 = inlined_call_operand.hbm [shape: f32[64,8,128], index: 3, kind: output, shape index: {}]  }
   0x1   :  { %10 = vsyncpa [#allocation3 + $0x1], 0 }
   0x2   :  { %11 = vsyncpa [#allocation4], 0 }
   0x3   :  { %13 = vsyncpa [#allocation4 + $0x1], 0  ;;  %s1395_s12 = smov 0   ;;  %s1397_s13 = smov 0  }
   0x4   :  { %s1399_s14 = smov 0   ;;  %s1401_s15 = smov 0  }
   0x5 LB: > { %s1416_s16 = sadd.s32 4294967295, %s1364_s15   ;;  %s1055_s17 = sadd.s32 4294967294, %s1364_s15   ;;  %s1364_s15 = sphi %s1401_s15, %s1670_s15   ;;  %s1360_s14 = sphi %s1399_s14, %s1669_s14   ;;  %s1356_s13 = sphi %s1397_s13, %s1668_s13   ;;  %s1352_s12 = sphi %s1395_s12, %s1667_s12  }
   0x6   : > { %s1420_s18 = sadd.s32 1, %s1364_s15   ;;  %s26_s19 = sadd.s32 1, %s1360_s14 }
   0x7   : > { %s23_s20 = ssub.s32 %s1364_s15, %s1420_s18  ;;  %p33_p0 = scmp.ne.s32.totalorder %s1360_s14, %s1356_s13 }
   0x8   : > { %p24_p1 = scmp.eq.s32.totalorder %s23_s20, 0  ;;  %p34_p2 = scmp.eq.s32.totalorder %s1364_s15, 0 }
   0x9   : > { %p39_p3 = scmp.ne.s32.totalorder %s1356_s13, %s1352_s12  ;;  %p40_p4 = scmp.eq.s32.totalorder %s1416_s16, 0 }
   0xa   : > { %s1432_s21 = scalar_select %p24_p1, %s1360_s14, %s26_s19  }
   0xb   : > { %p1434_p5 = por %p34_p2, %p33_p0  ;;  %p1438_p6 = por %p40_p4, %p39_p3 }
   0xc   : > { %p105_p7 = scmp.eq.s32.totalorder %s1416_s16, 15  ;;  %p111_p8 = scmp.eq.s32.totalorder %s1055_s17, 15 }
   0xd   : > { %s1660_s23 = scalar_select %p1438_p6, 1, 0 }
   0xe   : > { %p1208_p9 = scmp.lt.s32.totalorder %s1364_s15, 16  ;;  %p1444_p10 = por %p105_p7, %p33_p0 }
   0xf   : > { %p1448_p11 = por %p111_p8, %p39_p3  ;;  %s137_s26 = sand.u32 1, %s1360_s14  }
  0x10   : > { %s1661_s24 = scalar_select %p1444_p10, 1, 0 }
  0x11   : > { %s1662_s25 = scalar_select %p1448_p11, 1, 0 }
  0x12   : > { %s1098_s27 = sshll.u32 %s1364_s15, 9  ;;  %s1058_s28 = sshll.u32 %s137_s26, 5 }
  0x13   : > { %s1457_s4 = scalar_lea.hbm %s1653_s0, %s1098_s27  ;;  %s141_s5 = scalar_lea.vmem [#allocation2], %s1058_s28 }
  0x14   : > { %s149_s6 = sshll.u32 %s141_s5, 4  ;;  %p1461_p12 = pnand %p1208_p9, %p1434_p5  ;;  %s1465_s6 = int_to_ptr.vmem [resolvable:$true] %s149_s6 }
  0x15   : > { %s1467_s8 = scalar_lea.sflag [#allocation3], %s137_s26  ;;  %s1272_s9 = scalar_lea.hbm %s1457_s4, 512 }
  0x16   : > { %p1273_p13 = scmp.ne.s32.totalorder %s1457_s4, %s1272_s9  ;;  %p1274_p0 = pneg %p1461_p12 }
  0x17   : > { %s1277_s17 = scalar_lea.hbm %s1653_s0, 8192  ;;  %p1278_p3 = scmp.lt.s32.totalorder %s1457_s4, %s1653_s0 }
  0x18   : > { %p1275_p1 = pnand %p1274_p0, %p1273_p13  ;;  %p1279_p4 = scmp.lt.s32.totalorder %s1277_s17, %s1272_s9 }
  0x1a   : > { %p1276_p2 = pneg %p1275_p1  ;;  %p1280_p5 = por %p1279_p4, %p1278_p3 }
  0x1c   : > { %p1281_p7 = pnand %p1280_p5, %p1276_p2 }
  0x1e   : > { %1284 = shalt.err (!%p1281_p7)
}
  0x1f   : > { %s1285_s22 = scalar_lea.vmem %s1465_s6, 512  ;;  %s1366_s26 = smov [#allocation2]  }
  0x20   : > { %p1286_p8 = scmp.ne.s32.totalorder %s1465_s6, %s1285_s22  ;;  %s1290_s27 = sshll.u32 %s1366_s26, 4  ;;  %s1291_s27 = int_to_ptr.vmem [resolvable:$false] %s1290_s27 }
  0x21   : > { %s1292_s28 = scalar_lea.vmem %s1291_s27, 1024  ;;  %p1293_p1 = scmp.lt.s32.totalorder %s1465_s6, %s1291_s27 }
  0x22   : > { %p1288_p9 = pnand %p1286_p8, %p1274_p0  ;;  %p1294_p11 = scmp.lt.s32.totalorder %s1292_s28, %s1285_s22 }
  0x24   : > { %p1289_p13 = pneg %p1288_p9  ;;  %p1295_p10 = por %p1294_p11, %p1293_p1 }
  0x26   : > { %p1296_p6 = pnand %p1295_p10, %p1289_p13 }
  0x28   : > { %1299 = shalt.err (!%p1296_p6)
}
  0x29   : > { %s1367_s29 = smov 64   ;;  %s1368_s30 = smov 4  }
  0x2a   : > { %1203 = dma.hbm_to_vmem [thread:$0]  (!%p1461_p12), %s1457_s4, 512, %s1465_s6, %s1467_s8, %s1367_s29, %s1367_s29, %s1368_s30  }
  0x2b   : > { %p1062_p0 = scmp.ge.s32.totalorder %s1364_s15, 1  ;;  %p157_p2 = scmp.lt.s32.totalorder %s1364_s15, 17 }
  0x2d   : > { %p158_p3 = pnand %p1062_p0, %p157_p2 }
  0x2e   : > { %s1491_s5 = sand.u32 (!%p158_p3), 1, %s1356_s13   ;;  %p1664_p6 = scmp.ne.s32.totalorder (!%p158_p3), %s1660_s23, 0 }
  0x2f   : > { %161 = sbr.rel (%p158_p3) target bundleno = 2932 (0xb74), region = 32  ;;  %s1063_s9 = sshll.u32 (!%p158_p3), %s1491_s5, 5 }
  0x30   : > { %s164_s10 = scalar_lea.sflag (!%p158_p3), [#allocation3], %s1491_s5  ;;  %s1497_s11 = scalar_lea.vmem (!%p158_p3), [#allocation2], %s1063_s9 }
  0x34   : > { %1343 = dma.done.wait (%p1664_p6), %s164_s10, 512  }
  0x35   : > { %1345 = vsyncadd (%p1664_p6), %s164_s10, 4294966784  ;;  %v1369_v0 = vmov 0   ;;  %v1250_v1 = vld [vmem:[%s1497_s11] sm:$0xff]   ;;  %vm230_vm0 = vcmask 130048   ;;  %v1512_v3 = vld [vmem:[%s1654_s1 + $0x8] ss:$0 sps:$4 sm:$0xff]  }
  0x36   : > { %1249 = vset.pattern.permute.xlu0 %v1369_v0  ;;  %v1507_v2 = vld [vmem:[%s1654_s1] sm:$0xff]   ;;  %1128 = vmatprep.subr.bf16.mxu0 %v1250_v1  ;;  %v197_v4 = vld [vmem:[%s1655_s2 + $0x8] sm:$0xff]  ;;  %v198_v6 = vld [vmem:[%s1655_s2 + $0x10] sm:$0xff]  ;;  %v1370_v7 = vmov 0.0   ;;  %vm1371_vm1 = vmmov 0   ;;  %vm327_vm2 = vcmask 64512  }
  0x37   : > { %1129 = vmatpush3.bf16.msra.mxu0 %v1250_v1  ;;  %1130 = vmatprep.mubr.msk.bf16.mxu0 %vm230_vm0, %v1507_v2  ;;  %v196_v5 = vld [vmem:[%s1655_s2] sm:$0xff]  ;;  %v1253_v30 = vld [vmem:[%s1497_s11 + $0x8] sm:$0xff]   ;;  %s1558_s27 = scalar_lea.vmem [#allocation5], %s1063_s9  ;;  %v1254_v42 = vld [vmem:[%s1497_s11 + $0x10] sm:$0xff]   ;;  %s1099_s29 = sshll.u32 %s1416_s16, 9 }
  0x38   : > { %206 = vperm.xlu0 %1249, %v197_v4   ;;  %1140 = vmatprep.subr.mxu0 %v1370_v7  ;;  %s982_s28 = sshll.u32 %s1558_s27, 4  ;;  %s1610_s10 = scalar_lea.hbm %s1656_s3, %s1099_s29  ;;  %s1605_s28 = int_to_ptr.vmem [resolvable:$true] %s982_s28 }
  0x39   : > { %1134 = vmatprep.subr.bf16.mxu1 %v1370_v7  ;;  %1136 = vmatprep.mubr.msk.bf16.mxu1 %vm1371_vm1, %v1370_v7  ;;  %s1300_s4 = scalar_lea.vmem %s1605_s28, 512  ;;  %p1665_p11 = scmp.ne.s32.totalorder %s1661_s24, 0 }
  0x3a   : > { %1131 = vmatmul.mubr.msk.bf16.vlgmr.msra.gmra.mxu0 %vm230_vm0, %v1512_v3  ;;  %p1301_p10 = scmp.ne.s32.totalorder %s1605_s28, %s1300_s4  ;;  %s1372_s16 = smov [#allocation5]  }
  0x3b   : > { %1142 = vmatprep.mubr.msk.f32.mxu0 %vm1371_vm1, %v1370_v7  ;;  %s1304_s6 = sshll.u32 %s1372_s16, 4  ;;  %s1305_s6 = int_to_ptr.vmem [resolvable:$false] %s1304_s6 }
  0x3c   : > { %201 = vperm.xlu0 %1249, %v196_v5   ;;  %p1302_p12 = pnand %p1301_p10, %p1665_p11  ;;  %s1306_s7 = scalar_lea.vmem %s1305_s6, 1024 }
  0x3d   : > { %p1307_p5 = scmp.lt.s32.totalorder %s1605_s28, %s1305_s6  ;;  %p1308_p7 = scmp.lt.s32.totalorder %s1306_s7, %s1300_s4 }
  0x3e   : > { %p1303_p4 = pneg %p1302_p12 }
  0x3f   : > { %p1309_p8 = por %p1308_p7, %p1307_p5 }
  0x40   : > { %211 = vperm.xlu0 %1249, %v198_v6  }
  0x41   : > { %p1310_p9 = pnand %p1309_p8, %p1303_p4 }
  0xb3   : > { %v1533_v8 = vpop.permute.xlu0 %206 }
  0xb7   : > { %v1535_v9 = vpop.permute.xlu0 %201 }
  0xbb   : > { %v1537_v10 = vpop.permute.xlu0 %211 }
  0xfa   : > { %v1132_v11 = vpop.f32.mrf.mxu0 }
  0xfb   : > { %v280_v12 = vadd.f32 %v1132_v11, %v1537_v10 }
  0xfc   : > { %v271_v13 = vpop.f32.mrf.mxu0 }
  0xfd   : > { %1141 = vmatpush3.msra.mxu0 %v280_v12  ;;  %v272_v18 = vadd.f32 %v271_v13, %v1535_v9 }
  0xfe   : > { %v1133_v14 = vpop.f32.mrf.mxu0  ;;  %1145 = vmatprep.subr.bf16.mxu0 %v1253_v30 }
  0xff   : > { %v285_v19 = vpack.c.bf16 %v272_v18, %v272_v18 }
 0x100   : > { %v274_v15 = vpop.f32.mrf.mxu0 }
 0x101   : > { %v275_v16 = vadd.f32 %v274_v15, %v1533_v8 }
 0x103   : > { %v286_v17 = vpack.c.bf16 %v275_v16, %v275_v16 }
 0x105   : > { %1135 = vmatpush3.bf16.xpose.msra.mxu1 %v286_v17 }
 0x106   : > { %1151 = vmatprep.subr.bf16.mxu1 %v1370_v7 }
 0x10c   : > { %1137 = vmatmul.mubr.bf16.vlgmr.msra.gmra.mxu1 %v285_v19 }
 0x10d   : > { %1153 = vmatprep.mubr.msk.bf16.mxu1 %vm1371_vm1, %v1370_v7 }
 0x1cc   : > { %v321_v20 = vpop.f32.mrf.mxu1 }
 0x1cd   : > { %v328_v21 = vsel %vm327_vm2, %v321_v20, -inf }
 0x1ce   : > { %329 = vmax.xlane.f32.xlu1 %v328_v21  ;;  %v1138_v22 = vpop.f32.mrf.mxu1 }
 0x1cf   : > { %v1255_v22 = vld [vmem:[%s1497_s11 + $0x18] sm:$0xff]   ;;  %s969_s11 = scalar_lea.sflag [#allocation4], %s1491_s5 }
 0x1d0   : > { %v324_v23 = vpop.f32.mrf.mxu1 }
 0x1d2   : > { %v1139_v24 = vpop.f32.mrf.mxu1 }
 0x257   : > { %v330_v25 = vpop.xlane.xlu1 %329 }
 0x258   : > { %v331_v26 = vsub.f32 %v321_v20, %v330_v25 }
 0x25a   : > { %v332_v27 = vmul.f32 1.442695, %v331_v26 }
 0x25c   : > { %1256 = vpow2.f32 %v332_v27 }
 0x269   : > { %v1257_v28 = vpop.eup %1256 }
 0x26a   : > { %v334_v29 = vsel %vm327_vm2, %v1257_v28, 0.0 }
 0x26b   : > { %335 = vadd.xlane.f32.xlu1 %v334_v29 }
 0x2f4   : > { %v336_v31 = vpop.xlane.xlu1 %335 }
 0x2f5   : > { %1258 = vrcp.f32 %v336_v31 }
 0x302   : > { %v1259_v32 = vpop.eup %1258 }
 0x303   : > { %v338_v33 = vmul.f32 %v1259_v32, %v1257_v28 }
 0x305   : > { %1143 = vmatmul.mubr.msk.f32.vlgmr.msra.gmra.mxu0 %vm327_vm2, %v338_v33 }
 0x306   : > { %1146 = vmatpush3.bf16.msra.mxu0 %v1253_v30  ;;  %1147 = vmatprep.mubr.msk.bf16.mxu0 %vm230_vm0, %v1507_v2 }
 0x307   : > { %1157 = vmatprep.subr.mxu0 %v1370_v7 }
 0x309   : > { %1148 = vmatmul.mubr.msk.bf16.vlgmr.msra.gmra.mxu0 %vm230_vm0, %v1512_v3 }
 0x30a   : > { %1159 = vmatprep.mubr.msk.f32.mxu0 %vm1371_vm1, %v1370_v7 }
 0x3c5   : > { %v408_v34 = vpop.f32.mrf.mxu0 }
 0x3c6   : > { %412 = vst [vmem:[%s1558_s27] sm:$0xff] %v408_v34 }
 0x3c7   : > { %v1144_v35 = vpop.f32.mrf.mxu0 }
 0x3c9   : > { %v1149_v36 = vpop.f32.mrf.mxu0 }
 0x3ca   : > { %v465_v37 = vadd.f32 %v1149_v36, %v1537_v10 }
 0x3cb   : > { %v456_v38 = vpop.f32.mrf.mxu0 }
 0x3cc   : > { %1158 = vmatpush3.msra.mxu0 %v465_v37  ;;  %v457_v44 = vadd.f32 %v456_v38, %v1535_v9 }
 0x3cd   : > { %v1150_v39 = vpop.f32.mrf.mxu0  ;;  %1168 = vmatprep.subr.bf16.mxu0 %v1370_v7 }
 0x3ce   : > { %v470_v45 = vpack.c.bf16 %v457_v44, %v457_v44 }
 0x3cf   : > { %v459_v40 = vpop.f32.mrf.mxu0 }
 0x3d0   : > { %v460_v41 = vadd.f32 %v459_v40, %v1533_v8 }
 0x3d2   : > { %v471_v43 = vpack.c.bf16 %v460_v41, %v460_v41 }
 0x3d4   : > { %1152 = vmatpush3.bf16.xpose.msra.mxu1 %v471_v43 }
 0x3d5   : > { %1162 = vmatprep.subr.bf16.mxu1 %v1254_v42 }
 0x3db   : > { %1154 = vmatmul.mubr.bf16.vlgmr.msra.gmra.mxu1 %v470_v45 }
 0x3dc   : > { %1163 = vmatpush3.bf16.msra.mxu1 %v1254_v42  ;;  %1164 = vmatprep.mubr.msk.bf16.mxu1 %vm230_vm0, %v1507_v2 }
 0x3dd   : > { %1174 = vmatprep.subr.mxu1 %v1370_v7 }
 0x3e3   : > { %1165 = vmatmul.mubr.msk.bf16.vlgmr.msra.gmra.mxu1 %vm230_vm0, %v1512_v3 }
 0x3e4   : > { %1176 = vmatprep.mubr.msk.f32.mxu1 %vm1371_vm1, %v1370_v7 }
 0x49b   : > { %v506_v46 = vpop.f32.mrf.mxu1 }
 0x49c   : > { %v512_v47 = vsel %vm327_vm2, %v506_v46, -inf }
 0x49d   : > { %513 = vmax.xlane.f32.xlu1 %v512_v47  ;;  %v1155_v48 = vpop.f32.mrf.mxu1 }
 0x49f   : > { %v509_v49 = vpop.f32.mrf.mxu1 }
 0x4a1   : > { %v1156_v50 = vpop.f32.mrf.mxu1 }
 0x4a3   : > { %v1166_v51 = vpop.f32.mrf.mxu1 }
 0x4a4   : > { %v650_v52 = vadd.f32 %v1166_v51, %v1537_v10 }
 0x4a5   : > { %v641_v53 = vpop.f32.mrf.mxu1 }
 0x4a6   : > { %1175 = vmatpush3.msra.mxu1 %v650_v52  ;;  %v642_v4 = vadd.f32 %v641_v53, %v1535_v9 }
 0x4a7   : > { %v1167_v54 = vpop.f32.mrf.mxu1  ;;  %1179 = vmatprep.subr.bf16.mxu1 %v1255_v22 }
 0x4a8   : > { %v655_v5 = vpack.c.bf16 %v642_v4, %v642_v4 }
 0x4a9   : > { %v644_v61 = vpop.f32.mrf.mxu1 }
 0x4aa   : > { %v645_v62 = vadd.f32 %v644_v61, %v1533_v8 }
 0x4ac   : > { %v656_v1 = vpack.c.bf16 %v645_v62, %v645_v62 }
 0x526   : > { %v514_v55 = vpop.xlane.xlu1 %513 }
 0x527   : > { %v515_v56 = vsub.f32 %v506_v46, %v514_v55 }
 0x529   : > { %v516_v57 = vmul.f32 1.442695, %v515_v56 }
 0x52b   : > { %1260 = vpow2.f32 %v516_v57 }
 0x538   : > { %v1261_v58 = vpop.eup %1260 }
 0x539   : > { %v518_v59 = vsel %vm327_vm2, %v1261_v58, 0.0 }
 0x53a   : > { %519 = vadd.xlane.f32.xlu0 %v518_v59 }
 0x5c3   : > { %v520_v60 = vpop.xlane.xlu0 %519 }
 0x5c4   : > { %1262 = vrcp.f32 %v520_v60 }
 0x5d1   : > { %v1263_v63 = vpop.eup %1262 }
 0x5d2   : > { %v522_v0 = vmul.f32 %v1263_v63, %v1261_v58 }
 0x5d4   : > { %1160 = vmatmul.mubr.msk.f32.vlgmr.msra.gmra.mxu0 %vm327_vm2, %v522_v0 }
 0x5d5   : > { %1169 = vmatpush3.bf16.xpose.msra.mxu0 %v656_v1  ;;  %1170 = vmatprep.mubr.msk.bf16.mxu0 %vm1371_vm1, %v1370_v7 }
 0x5d6   : > { %1185 = vmatprep.subr.bf16.mxu0 %v1370_v7 }
 0x5dc   : > { %1171 = vmatmul.mubr.bf16.vlgmr.msra.gmra.mxu0 %v655_v5 }
 0x5dd   : > { %1187 = vmatprep.mubr.msk.bf16.mxu0 %vm1371_vm1, %v1370_v7 }
 0x694   : > { %v592_v6 = vpop.f32.mrf.mxu0 }
 0x695   : > { %1077 = vst [vmem:[%s1558_s27 + $0x8] sm:$0xff] %v592_v6 }
 0x696   : > { %v1161_v11 = vpop.f32.mrf.mxu0 }
 0x69c   : > { %v691_v12 = vpop.f32.mrf.mxu0 }
 0x69d   : > { %v697_v13 = vsel %vm327_vm2, %v691_v12, -inf }
 0x69e   : > { %698 = vmax.xlane.f32.xlu1 %v697_v13  ;;  %v1172_v14 = vpop.f32.mrf.mxu0 }
 0x6a0   : > { %v694_v15 = vpop.f32.mrf.mxu0 }
 0x6a2   : > { %v1173_v16 = vpop.f32.mrf.mxu0 }
 0x727   : > { %v699_v17 = vpop.xlane.xlu1 %698 }
 0x728   : > { %v700_v18 = vsub.f32 %v691_v12, %v699_v17 }
 0x72a   : > { %v701_v19 = vmul.f32 1.442695, %v700_v18 }
 0x72c   : > { %1264 = vpow2.f32 %v701_v19 }
 0x739   : > { %v1265_v20 = vpop.eup %1264 }
 0x73a   : > { %v703_v21 = vsel %vm327_vm2, %v1265_v20, 0.0 }
 0x73b   : > { %704 = vadd.xlane.f32.xlu1 %v703_v21 }
 0x7c4   : > { %v705_v23 = vpop.xlane.xlu1 %704 }
 0x7c5   : > { %1266 = vrcp.f32 %v705_v23 }
 0x7d2   : > { %v1267_v24 = vpop.eup %1266 }
 0x7d3   : > { %v707_v25 = vmul.f32 %v1267_v24, %v1265_v20 }
 0x7d5   : > { %1177 = vmatmul.mubr.msk.f32.vlgmr.msra.gmra.mxu1 %vm327_vm2, %v707_v25 }
 0x7d6   : > { %1180 = vmatpush3.bf16.msra.mxu1 %v1255_v22  ;;  %1181 = vmatprep.mubr.msk.bf16.mxu1 %vm230_vm0, %v1507_v2 }
 0x7d7   : > { %1191 = vmatprep.subr.mxu1 %v1370_v7 }
 0x7d9   : > { %1182 = vmatmul.mubr.msk.bf16.vlgmr.msra.gmra.mxu1 %vm230_vm0, %v1512_v3 }
 0x7da   : > { %1193 = vmatprep.mubr.msk.f32.mxu1 %vm1371_vm1, %v1370_v7 }
 0x895   : > { %v777_v26 = vpop.f32.mrf.mxu1 }
 0x896   : > { %1084 = vst [vmem:[%s1558_s27 + $0x10] sm:$0xff] %v777_v26 }
 0x897   : > { %v1178_v27 = vpop.f32.mrf.mxu1 }
 0x899   : > { %v1183_v28 = vpop.f32.mrf.mxu1 }
 0x89a   : > { %v835_v29 = vadd.f32 %v1183_v28, %v1537_v10 }
 0x89b   : > { %v826_v30 = vpop.f32.mrf.mxu1 }
 0x89c   : > { %1192 = vmatpush3.msra.mxu1 %v835_v29  ;;  %v827_v34 = vadd.f32 %v826_v30, %v1535_v9 }
 0x89d   : > { %v1184_v31 = vpop.f32.mrf.mxu1 }
 0x89e   : > { %v840_v3 = vpack.c.bf16 %v827_v34, %v827_v34 }
 0x89f   : > { %v829_v32 = vpop.f32.mrf.mxu1 }
 0x8a0   : > { %v830_v2 = vadd.f32 %v829_v32, %v1533_v8 }
 0x8a2   : > { %v841_v33 = vpack.c.bf16 %v830_v2, %v830_v2 }
 0x8a4   : > { %1186 = vmatpush3.bf16.xpose.msra.mxu0 %v841_v33 }
 0x8ab   : > { %1188 = vmatmul.mubr.bf16.vlgmr.msra.gmra.mxu0 %v840_v3 }
 0x96b   : > { %v876_v35 = vpop.f32.mrf.mxu0 }
 0x96c   : > { %v882_v7 = vsel %vm327_vm2, %v876_v35, -inf }
 0x96d   : > { %883 = vmax.xlane.f32.xlu1 %v882_v7  ;;  %v1189_v36 = vpop.f32.mrf.mxu0 }
 0x96f   : > { %v879_v10 = vpop.f32.mrf.mxu0 }
 0x971   : > { %v1190_v37 = vpop.f32.mrf.mxu0 }
 0x9f6   : > { %v884_v38 = vpop.xlane.xlu1 %883 }
 0x9f7   : > { %v885_v39 = vsub.f32 %v876_v35, %v884_v38 }
 0x9f9   : > { %v886_v40 = vmul.f32 1.442695, %v885_v39 }
 0x9fb   : > { %1268 = vpow2.f32 %v886_v40 }
 0xa08   : > { %v1269_v8 = vpop.eup %1268 }
 0xa09   : > { %v888_v9 = vsel %vm327_vm2, %v1269_v8, 0.0 }
 0xa0a   : > { %889 = vadd.xlane.f32.xlu1 %v888_v9 }
 0xa93   : > { %v890_v41 = vpop.xlane.xlu1 %889 }
 0xa94   : > { %1270 = vrcp.f32 %v890_v41 }
 0xaa1   : > { %v1271_v42 = vpop.eup %1270 }
 0xaa2   : > { %v892_v43 = vmul.f32 %v1271_v42, %v1269_v8 }
 0xaa4   : > { %1194 = vmatmul.mubr.msk.f32.vlgmr.msra.gmra.mxu1 %vm327_vm2, %v892_v43 }
 0xb64   : > { %v962_v44 = vpop.f32.mrf.mxu1 }
 0xb65   : > { %1091 = vst [vmem:[%s1558_s27 + $0x18] sm:$0xff] %v962_v44 }
 0xb66   : > { %v1195_v45 = vpop.f32.mrf.mxu1 }
 0xb67   : > { %1313 = shalt.err (!%p1310_p9)
}
 0xb68   : > { %s1314_s8 = scalar_lea.hbm %s1610_s10, 512  ;;  %s1318_s23 = scalar_lea.hbm %s1656_s3, 8192 }
 0xb69   : > { %p1315_p13 = scmp.ne.s32.totalorder %s1610_s10, %s1314_s8  ;;  %p1319_p2 = scmp.lt.s32.totalorder %s1610_s10, %s1656_s3 }
 0xb6a   : > { %p1320_p3 = scmp.lt.s32.totalorder %s1318_s23, %s1314_s8 }
 0xb6b   : > { %p1316_p1 = pnand %p1315_p13, %p1665_p11 }
 0xb6c   : > { %p1321_p6 = por %p1320_p3, %p1319_p2 }
 0xb6d   : > { %p1317_p0 = pneg %p1316_p1 }
 0xb6f   : > { %p1322_p10 = pnand %p1321_p6, %p1317_p0 }
 0xb71   : > { %1325 = shalt.err (!%p1322_p10)
}
 0xb72   : > { %s1373_s26 = smov 128   ;;  %s1374_s27 = smov 8  }
 0xb73   : > { %1198 = dma.vmem_to_hbm [thread:$0]  (%p1665_p11), %s1605_s28, 512, %s1610_s10, %s969_s11, %s1373_s26, %s1373_s26, %s1374_s27  }
 0xb74 PF: > { %p1209_p12 = scmp.ge.s32.totalorder %s1364_s15, 2  ;;  %s997_s29 = sand.u32 1, %s1352_s12  }
 0xb75   : > { %p1666_p4 = scmp.ne.s32.totalorder %s1662_s25, 0  ;;  %s998_s30 = scalar_lea.sflag [#allocation4], %s997_s29 }
 0xb77   : > { %p1205_p5 = pnand %p1209_p12, %p1666_p4 }
 0xb79   : > { %p1206_p7 = pneg %p1205_p5 }
 0xb7b   : > { %1347 = dma.done.wait (%p1206_p7), %s998_s30, 512  }
 0xb7c   : > { %1349 = vsyncadd (%p1206_p7), %s998_s30, 4294966784  ;;  %p16_p8 = scmp.ge.s32.totalorder %s1420_s18, 18   ;;  %s1667_s12 = smov %s1356_s13 }
 0xb7d   : > { %s1668_s13 = smov %s1360_s14  ;;  %s1669_s14 = smov %s1432_s21 }
 0xb7e   : > { %s1670_s15 = smov %s1420_s18  ;;  %18 = sbr.rel (!%p16_p8) target bundleno = 5 (0x5), region = 83 }
 0xb83   :  { %1003 = vsyncpa [#allocation3], 1 }
 0xb84   :  { %1005 = vsyncpa [#allocation3 + $0x1], 1 }
 0xb85   :  { %1006 = vsyncpa [#allocation4], 1 }
 0xb86   :  { %1008 = vsyncpa [#allocation4 + $0x1], 1 }

</bundles_post_ra>
